<compile_context>
chip_gen: v5e
topology: v5e:2x2
jax: 0.10.0
libtpu: 0.0.40
codegen_flags: <defaults>
</compile_context>

<pallas_src>
import functools

import jax
import jax.numpy as jnp
from jax.experimental import pallas as pl
from jax.experimental.pallas import tpu as pltpu


def _ca_kernel(x_ref, w1t_ref, b1_ref, w2_ref, b2_ref, o_ref, acc_ref, s_ref,
               *, hw, hw_tile):
    phase = pl.program_id(1)
    hw_i = pl.program_id(2)

    @pl.when(phase == 0)
    def _pool_and_mlp():
        @pl.when(hw_i == 0)
        def _():
            acc_ref[...] = jnp.zeros_like(acc_ref)

        x = x_ref[0]                                           # (C, hw_tile)
        if hw % hw_tile != 0:
            # Ragged last tile: out-of-bounds lanes hold undefined data ->
            # mask them to zero before the spatial reduction (static branch).
            lane = (jax.lax.broadcasted_iota(jnp.int32, x.shape, 1)
                    + hw_i * hw_tile)
            x = jnp.where(lane < hw, x, jnp.zeros_like(x))
        # Partial spatial sum of this HW tile, accumulated in f32.
        acc_ref[...] += jnp.sum(x, axis=-1, keepdims=True, dtype=jnp.float32)

        @pl.when(hw_i == pl.num_programs(2) - 1)
        def _mlp():
            y = acc_ref[...] * (1.0 / float(hw))               # (C, 1) pooled mean
            # Conv2d(C, Cr, 1) + bias: h[j] = sum_c w1[j, c] * y[c] + b1[j]
            h = jnp.sum(w1t_ref[...].astype(jnp.float32) * y, axis=0,
                        keepdims=True)                         # (1, Cr)
            h = jnp.maximum(h + b1_ref[...].astype(jnp.float32), 0.0)
            # Conv2d(Cr, C, 1) + bias: s[c] = sum_j w2[c, j] * h[j] + b2[c]
            s = jnp.sum(w2_ref[...].astype(jnp.float32) * h, axis=-1,
                        keepdims=True)                         # (C, 1)
            s_ref[...] = jax.nn.sigmoid(s + b2_ref[...].astype(jnp.float32))

    @pl.when(phase == 1)
    def _rescale():
        # Broadcast multiply in the input dtype (bf16 inputs never get upcast
        # here -> half the vreg pressure / HBM write bytes).
        scale = s_ref[...].astype(x_ref.dtype)                 # (C, 1)
        o_ref[0] = (x_ref[0] * scale).astype(o_ref.dtype)


def _pick_hw_tile(hw, c, itemsize, max_tile_bytes):
    # Lane-dense tile: multiple of 128 lanes, capped so double-buffered in+out
    # (~4x tile bytes) stays far below the scoped-VMEM budget on every chip.
    lanes_cap = max(128, (max_tile_bytes // max(1, c * itemsize)) // 128 * 128)
    # If the whole spatial extent fits, use it directly (block == full array
    # dim is always legal, even when HW is not a multiple of 128).
    return hw if hw <= lanes_cap else lanes_cap


def ca_layer(x, w1, b1, w2, b2, *, max_tile_bytes=2 * 1024 * 1024):
    """x: (B, C, H, W) NCHW. Returns x * sigmoid(conv2(relu(conv1(avgpool(x)))))."""
    B, C, H, W = x.shape
    HW = H * W
    Cr = w1.shape[0]

    x_flat = x.reshape(B, C, HW)                # free reshape (collapse minor dims)

    hw_tile = _pick_hw_tile(HW, C, x.dtype.itemsize, max_tile_bytes)
    n_hw = pl.cdiv(HW, hw_tile)

    w1t = w1.T                                  # (C, Cr)  sublane-reduce layout
    b1_row = b1.reshape(1, Cr)                  # lane-dense bias
    b2_col = b2.reshape(C, 1)                   # matches (C, 1) scale layout

    tile_bytes = C * hw_tile * x.dtype.itemsize
    vmem_limit = int(min(48 * 2**20, max(32 * 2**20, 8 * tile_bytes)))

    x_bytes = x_flat.size * x.dtype.itemsize
    x_read_bytes = x_bytes if n_hw == 1 else 2 * x_bytes   # single-tile => one read
    cost = pl.CostEstimate(
        flops=int(2 * B * C * HW + 4 * B * C * Cr),
        transcendentals=int(B * C),
        bytes_accessed=int(x_read_bytes + x_bytes
                           + 4 * (w1.size + b1.size + w2.size + b2.size)),
    )

    out_flat = pl.pallas_call(
        functools.partial(_ca_kernel, hw=HW, hw_tile=hw_tile),
        out_shape=jax.ShapeDtypeStruct((B, C, HW), x.dtype),
        grid_spec=pltpu.PrefetchScalarGridSpec(
            num_scalar_prefetch=0,
            grid=(B, 2, n_hw),                  # (batch, phase, hw tile)
            in_specs=[
                pl.BlockSpec((1, C, hw_tile), lambda b, p, h: (b, 0, h)),  # x tile
                pl.BlockSpec((C, Cr), lambda b, p, h: (0, 0)),             # w1^T
                pl.BlockSpec((1, Cr), lambda b, p, h: (0, 0)),             # b1
                pl.BlockSpec((C, Cr), lambda b, p, h: (0, 0)),             # w2
                pl.BlockSpec((C, 1), lambda b, p, h: (0, 0)),              # b2
            ],
            # Phase 0 parks the output on block 0 (never written -> never
            # flushed); phase 1 walks the tiles and writes them lane-dense.
            out_specs=pl.BlockSpec((1, C, hw_tile), lambda b, p, h: (b, 0, h * p)),
            scratch_shapes=[pltpu.VMEM((C, 1), jnp.float32),   # pooled-sum acc
                            pltpu.VMEM((C, 1), jnp.float32)],  # sigmoid scale
        ),
        compiler_params=pltpu.CompilerParams(
            dimension_semantics=("parallel", "arbitrary", "arbitrary"),
            vmem_limit_bytes=vmem_limit,
        ),
        cost_estimate=cost,
    )(x_flat, w1t, b1_row, w2, b2_col)

    return out_flat.reshape(B, C, H, W)


def _reference(x, w1, b1, w2, b2):
    # Pure-JAX reference for sanity checking.
    y = jnp.mean(x, axis=(2, 3), keepdims=True)                       # (B,C,1,1)
    y = jnp.einsum("oc,bcij->boij", w1, y) + b1[None, :, None, None]  # (B,Cr,1,1)
    y = jnp.maximum(y, 0.0)
    y = jnp.einsum("oc,bcij->boij", w2, y) + b2[None, :, None, None]  # (B,C,1,1)
    y = jax.nn.sigmoid(y)
    return x * y


if __name__ == "__main__":
    # Shapes consistent with CALayer(channel=32, reduction=16).
    B, C, H, W = 2, 32, 16, 16
    reduction = 16
    Cr = C // reduction

    key = jax.random.PRNGKey(0)
    kx, k1, k2, k3, k4 = jax.random.split(key, 5)

    x = jax.random.normal(kx, (B, C, H, W), dtype=jnp.float32)
    # 1x1 conv weights squeezed to 2-D matrices, as in the PyTorch module.
    w1 = jax.random.normal(k1, (Cr, C), dtype=jnp.float32) * 0.1   # conv1 weight (Cr,C,1,1)
    b1 = jax.random.normal(k2, (Cr,), dtype=jnp.float32) * 0.1     # conv1 bias
    w2 = jax.random.normal(k3, (C, Cr), dtype=jnp.float32) * 0.1   # conv2 weight (C,Cr,1,1)
    b2 = jax.random.normal(k4, (C,), dtype=jnp.float32) * 0.1      # conv2 bias

    out = jax.block_until_ready(ca_layer(x, w1, b1, w2, b2))
    ref = _reference(x, w1, b1, w2, b2)
    assert out.shape == (B, C, H, W)
    assert jnp.allclose(out, ref, atol=1e-5, rtol=1e-5), "mismatch vs reference"

    # Also exercise the multi-tile + ragged-last-tile path (tiny tile cap).
    B2, C2, H2, W2, r2 = 1, 8, 10, 13, 4
    Cr2 = C2 // r2
    k5, k6, k7, k8, k9 = jax.random.split(jax.random.PRNGKey(1), 5)
    x2 = jax.random.normal(k5, (B2, C2, H2, W2), dtype=jnp.float32)
    w1b = jax.random.normal(k6, (Cr2, C2), dtype=jnp.float32) * 0.1
    b1b = jax.random.normal(k7, (Cr2,), dtype=jnp.float32) * 0.1
    w2b = jax.random.normal(k8, (C2, Cr2), dtype=jnp.float32) * 0.1
    b2b = jax.random.normal(k9, (C2,), dtype=jnp.float32) * 0.1

    out2 = jax.block_until_ready(ca_layer(x2, w1b, b1b, w2b, b2b, max_tile_bytes=1))
    ref2 = _reference(x2, w1b, b1b, w2b, b2b)
    assert jnp.allclose(out2, ref2, atol=1e-5, rtol=1e-5), "ragged-tile mismatch"

    print("KERNEL_OK")
</pallas_src>

<mosaic_0001>
module attributes {stable_mosaic.version = 11 : i64} {
  func.func @_ca_kernel(%arg0: i32, %arg1: i32, %arg2: i32, %arg3: memref<1x32x256xf32, #tpu.memory_space<vmem>>, %arg4: memref<32x2xf32, #tpu.memory_space<vmem>>, %arg5: memref<1x2xf32, #tpu.memory_space<vmem>>, %arg6: memref<32x2xf32, #tpu.memory_space<vmem>>, %arg7: memref<32x1xf32, #tpu.memory_space<vmem>>, %arg8: memref<1x32x256xf32, #tpu.memory_space<vmem>>, %arg9: memref<32x1xf32, #tpu.memory_space<vmem>>, %arg10: memref<32x1xf32, #tpu.memory_space<vmem>>) attributes {dimension_semantics = [#tpu.dimension_semantics<parallel>, #tpu.dimension_semantics<arbitrary>, #tpu.dimension_semantics<arbitrary>], iteration_bounds = array<i64: 2, 2, 1>, scalar_prefetch = 0 : i64, scratch_operands = 2 : i64, tpu.core_type = #tpu.core_type<tc>, window_params = [{transform_indices = @transform_0, window_bounds = array<i64: 1, 32, 256>}, {pipeline_mode = #tpu.pipeline_mode<synchronous>, transform_indices = @transform_1, window_bounds = array<i64: 32, 2>}, {pipeline_mode = #tpu.pipeline_mode<synchronous>, transform_indices = @transform_2, window_bounds = array<i64: 1, 2>}, {pipeline_mode = #tpu.pipeline_mode<synchronous>, transform_indices = @transform_3, window_bounds = array<i64: 32, 2>}, {pipeline_mode = #tpu.pipeline_mode<synchronous>, transform_indices = @transform_4, window_bounds = array<i64: 32, 1>}, {transform_indices = @transform_5, window_bounds = array<i64: 1, 32, 256>}]} {
    %c0_i32 = arith.constant 0 : i32
    %0 = arith.cmpi eq, %arg1, %c0_i32 : i32
    %1 = arith.extui %0 : i1 to i32
    %c0_i32_0 = arith.constant 0 : i32
    %2 = arith.cmpi ne, %1, %c0_i32_0 : i32
    scf.if %2 {
      %c0_i32_2 = arith.constant 0 : i32
      %6 = arith.cmpi eq, %arg2, %c0_i32_2 : i32
      %7 = arith.extui %6 : i1 to i32
      %c0_i32_3 = arith.constant 0 : i32
      %8 = arith.cmpi ne, %7, %c0_i32_3 : i32
      scf.if %8 {
        %cst_12 = arith.constant 0.000000e+00 : f32
        %19 = vector.broadcast %cst_12 : f32 to vector<32x1xf32>
        %c0_13 = arith.constant 0 : index
        %c0_14 = arith.constant 0 : index
        %20 = vector.load %arg9[%c0_13, %c0_14] : memref<32x1xf32, #tpu.memory_space<vmem>>, vector<32x1xf32>
        tpu.vector_store %arg9[%c0_13, %c0_14], %19 {strides = array<i32>} : memref<32x1xf32, #tpu.memory_space<vmem>>, vector<32x1xf32>,
      } else {
      }
      %c0 = arith.constant 0 : index
      %c0_4 = arith.constant 0 : index
      %c0_5 = arith.constant 0 : index
      %9 = vector.load %arg3[%c0, %c0_4, %c0_5] : memref<1x32x256xf32, #tpu.memory_space<vmem>>, vector<1x32x256xf32>
      %10 = vector.shape_cast %9 : vector<1x32x256xf32> to vector<32x256xf32>
      %c0_6 = arith.constant 0 : index
      %c0_7 = arith.constant 0 : index
      %11 = vector.load %arg9[%c0_6, %c0_7] : memref<32x1xf32, #tpu.memory_space<vmem>>, vector<32x1xf32>
      %cst = arith.constant dense<0.000000e+00> : vector<32xf32>
      %12 = vector.multi_reduction <add>, %10, %cst [1] : vector<32x256xf32> to vector<32xf32>
      %13 = vector.shape_cast %12 : vector<32xf32> to vector<32x1xf32>
      %14 = arith.addf %11, %13 : vector<32x1xf32>
      %c0_8 = arith.constant 0 : index
      %c0_9 = arith.constant 0 : index
      %15 = vector.load %arg9[%c0_8, %c0_9] : memref<32x1xf32, #tpu.memory_space<vmem>>, vector<32x1xf32>
      tpu.vector_store %arg9[%c0_8, %c0_9], %14 {strides = array<i32>} : memref<32x1xf32, #tpu.memory_space<vmem>>, vector<32x1xf32>,
      %c0_i32_10 = arith.constant 0 : i32
      %16 = arith.cmpi eq, %arg2, %c0_i32_10 : i32
      %17 = arith.extui %16 : i1 to i32
      %c0_i32_11 = arith.constant 0 : i32
      %18 = arith.cmpi ne, %17, %c0_i32_11 : i32
      scf.if %18 {
        %c0_12 = arith.constant 0 : index
        %c0_13 = arith.constant 0 : index
        %19 = vector.load %arg9[%c0_12, %c0_13] : memref<32x1xf32, #tpu.memory_space<vmem>>, vector<32x1xf32>
        %cst_14 = arith.constant 3.906250e-03 : f32
        %20 = vector.broadcast %cst_14 : f32 to vector<32x1xf32>
        %21 = arith.mulf %19, %20 : vector<32x1xf32>
        %c0_15 = arith.constant 0 : index
        %c0_16 = arith.constant 0 : index
        %22 = vector.load %arg4[%c0_15, %c0_16] : memref<32x2xf32, #tpu.memory_space<vmem>>, vector<32x2xf32>
        %23 = vector.broadcast %21 : vector<32x1xf32> to vector<32x2xf32>
        %24 = arith.mulf %22, %23 : vector<32x2xf32>
        %cst_17 = arith.constant dense<0.000000e+00> : vector<2xf32>
        %25 = vector.multi_reduction <add>, %24, %cst_17 [0] : vector<32x2xf32> to vector<2xf32>
        %26 = vector.shape_cast %25 : vector<2xf32> to vector<1x2xf32>
        %c0_18 = arith.constant 0 : index
        %c0_19 = arith.constant 0 : index
        %27 = vector.load %arg5[%c0_18, %c0_19] : memref<1x2xf32, #tpu.memory_space<vmem>>, vector<1x2xf32>
        %28 = arith.addf %26, %27 : vector<1x2xf32>
        %cst_20 = arith.constant 0.000000e+00 : f32
        %29 = vector.broadcast %cst_20 : f32 to vector<1x2xf32>
        %30 = arith.maximumf %28, %29 : vector<1x2xf32>
        %c0_21 = arith.constant 0 : index
        %c0_22 = arith.constant 0 : index
        %31 = vector.load %arg6[%c0_21, %c0_22] : memref<32x2xf32, #tpu.memory_space<vmem>>, vector<32x2xf32>
        %32 = vector.broadcast %30 : vector<1x2xf32> to vector<32x2xf32>
        %33 = arith.mulf %31, %32 : vector<32x2xf32>
        %cst_23 = arith.constant dense<0.000000e+00> : vector<32xf32>
        %34 = vector.multi_reduction <add>, %33, %cst_23 [1] : vector<32x2xf32> to vector<32xf32>
        %35 = vector.shape_cast %34 : vector<32xf32> to vector<32x1xf32>
        %c0_24 = arith.constant 0 : index
        %c0_25 = arith.constant 0 : index
        %36 = vector.load %arg7[%c0_24, %c0_25] : memref<32x1xf32, #tpu.memory_space<vmem>>, vector<32x1xf32>
        %37 = arith.addf %35, %36 : vector<32x1xf32>
        %38 = arith.negf %37 : vector<32x1xf32>
        %39 = math.exp %38 : vector<32x1xf32>
        %cst_26 = arith.constant 1.000000e+00 : f32
        %40 = vector.broadcast %cst_26 : f32 to vector<32x1xf32>
        %41 = arith.addf %40, %39 : vector<32x1xf32>
        %42 = arith.divf %40, %41 : vector<32x1xf32>
        %c0_27 = arith.constant 0 : index
        %c0_28 = arith.constant 0 : index
        %43 = vector.load %arg10[%c0_27, %c0_28] : memref<32x1xf32, #tpu.memory_space<vmem>>, vector<32x1xf32>
        tpu.vector_store %arg10[%c0_27, %c0_28], %42 {strides = array<i32>} : memref<32x1xf32, #tpu.memory_space<vmem>>, vector<32x1xf32>,
      } else {
      }
    } else {
    }
    %c1_i32 = arith.constant 1 : i32
    %3 = arith.cmpi eq, %arg1, %c1_i32 : i32
    %4 = arith.extui %3 : i1 to i32
    %c0_i32_1 = arith.constant 0 : i32
    %5 = arith.cmpi ne, %4, %c0_i32_1 : i32
    scf.if %5 {
      %c0 = arith.constant 0 : index
      %c0_2 = arith.constant 0 : index
      %6 = vector.load %arg10[%c0, %c0_2] : memref<32x1xf32, #tpu.memory_space<vmem>>, vector<32x1xf32>
      %c0_3 = arith.constant 0 : index
      %c0_4 = arith.constant 0 : index
      %c0_5 = arith.constant 0 : index
      %7 = vector.load %arg3[%c0_3, %c0_4, %c0_5] : memref<1x32x256xf32, #tpu.memory_space<vmem>>, vector<1x32x256xf32>
      %8 = vector.shape_cast %7 : vector<1x32x256xf32> to vector<32x256xf32>
      %9 = vector.broadcast %6 : vector<32x1xf32> to vector<32x256xf32>
      %10 = arith.mulf %8, %9 : vector<32x256xf32>
      %c0_6 = arith.constant 0 : index
      %c0_7 = arith.constant 0 : index
      %c0_8 = arith.constant 0 : index
      %11 = vector.load %arg8[%c0_6, %c0_7, %c0_8] : memref<1x32x256xf32, #tpu.memory_space<vmem>>, vector<1x32x256xf32>
      %12 = vector.shape_cast %11 : vector<1x32x256xf32> to vector<32x256xf32>
      %13 = vector.shape_cast %10 : vector<32x256xf32> to vector<1x32x256xf32>
      tpu.vector_store %arg8[%c0_6, %c0_7, %c0_8], %13 {strides = array<i32>} : memref<1x32x256xf32, #tpu.memory_space<vmem>>, vector<1x32x256xf32>,
    } else {
    }
    return
  }
  func.func @transform_0(%arg0: i32, %arg1: i32, %arg2: i32) -> (i32, i32, i32) {
    %c0_i32 = arith.constant 0 : i32
    %c0_i32_0 = arith.constant 0 : i32
    return %arg0, %c0_i32, %arg2 : i32, i32, i32
  }
  func.func @transform_1(%arg0: i32, %arg1: i32, %arg2: i32) -> (i32, i32) {
    %c0_i32 = arith.constant 0 : i32
    %c0_i32_0 = arith.constant 0 : i32
    %c0_i32_1 = arith.constant 0 : i32
    return %c0_i32, %c0_i32_0 : i32, i32
  }
  func.func @transform_2(%arg0: i32, %arg1: i32, %arg2: i32) -> (i32, i32) {
    %c0_i32 = arith.constant 0 : i32
    %c0_i32_0 = arith.constant 0 : i32
    %c0_i32_1 = arith.constant 0 : i32
    return %c0_i32, %c0_i32_0 : i32, i32
  }
  func.func @transform_3(%arg0: i32, %arg1: i32, %arg2: i32) -> (i32, i32) {
    %c0_i32 = arith.constant 0 : i32
    %c0_i32_0 = arith.constant 0 : i32
    %c0_i32_1 = arith.constant 0 : i32
    return %c0_i32, %c0_i32_0 : i32, i32
  }
  func.func @transform_4(%arg0: i32, %arg1: i32, %arg2: i32) -> (i32, i32) {
    %c0_i32 = arith.constant 0 : i32
    %c0_i32_0 = arith.constant 0 : i32
    %c0_i32_1 = arith.constant 0 : i32
    return %c0_i32, %c0_i32_0 : i32, i32
  }
  func.func @transform_5(%arg0: i32, %arg1: i32, %arg2: i32) -> (i32, i32, i32) {
    %0 = arith.muli %arg2, %arg1 : i32
    %c0_i32 = arith.constant 0 : i32
    %c0_i32_0 = arith.constant 0 : i32
    return %arg0, %c0_i32, %0 : i32, i32, i32
  }
}

</mosaic_0001>

<bundles_post_ra>
// kernel: tpu_custom_call.1
= control target key start
LH: loop header
LB: loop body
LE: loop exit
PB: predicated region body
PF: predicated region fallthrough
CT: control target
= control target key end

     0   :  { %10 = vsyncpa [#allocation5], 0  ;;  %s1174_s0 = inlined_call_operand.hbm [shape: f32[2,32,256], index: 0, kind: input, shape index: {}]   ;;  %s1175_s1 = inlined_call_operand.vmem [shape: f32[32,2], index: 1, kind: input, shape index: {}]   ;;  %s1176_s2 = inlined_call_operand.vmem [shape: f32[1,2], index: 2, kind: input, shape index: {}]   ;;  %s1177_s3 = inlined_call_operand.vmem [shape: f32[32,2], index: 3, kind: input, shape index: {}]   ;;  %s1178_s4 = inlined_call_operand.vmem [shape: f32[32,1], index: 4, kind: input, shape index: {}]   ;;  %s1179_s5 = inlined_call_operand.hbm [shape: f32[2,32,256], index: 5, kind: output, shape index: {}]  }
   0x1   :  { %12 = vsyncpa [#allocation5 + $0x1], 0 }
   0x2   :  { %13 = vsyncpa [#allocation6], 0 }
   0x3   :  { %15 = vsyncpa [#allocation6 + $0x1], 0  ;;  %s946_s18 = smov 0   ;;  %s948_s19 = smov 0  }
   0x4   :  { %s950_s20 = smov 0   ;;  %s952_s21 = smov 0  }
   0x5   :  { %s954_s22 = smov 0   ;;  %s956_s23 = smov 0  }
   0x6   :  { %s958_s24 = smov 0   ;;  %s960_s25 = smov 0  }
   0x7 LB: > { %1182 = sst [smem:[#allocation10_spill]] %s899_s23  ;;  %s650_s26 = sadd.s32 4294967295, %s907_s25   ;;  %s907_s25 = sphi %s960_s25, %s21_s25   ;;  %s903_s24 = sphi %s958_s24, %s1196_s24   ;;  %s899_s23 = sphi %s956_s23, %s1190_s23   ;;  %s895_s22 = sphi %s954_s22, %s1195_s22   ;;  %s891_s21 = sphi %s952_s21, %s1189_s21   ;;  %s887_s20 = sphi %s950_s20, %s1194_s20   ;;  %s883_s19 = sphi %s948_s19, %s1193_s19   ;;  %s879_s18 = sphi %s946_s18, %s1192_s18  }
   0x8   : > { %s651_s27 = sadd.s32 4294967294, %s907_s25   ;;  %s36_s28 = sadd.s32 1, %s899_s23 }
   0x9   : > { %s40_s29 = sadd.s32 1, %s903_s24  ;;  %p38_p0 = scmp.ge.s32.totalorder %s36_s28, 2 }
   0xa   : > { %s49_s30 = sadd.s32 1, %s887_s20  ;;  %p56_p1 = scmp.ne.s32.totalorder %s887_s20, %s883_s19 }
   0xb   : > { %p57_p2 = scmp.eq.s32.totalorder %s907_s25, 0  ;;  %s1198_s28 = smov (%p38_p0, %s36_s28), 0 }
   0xc   : > { %1183 = sst [smem:[#allocation11_spill]] %s1198_s28  ;;  %s1200_s29 = smov (!%p38_p0, %s40_s29), %s903_s24 }
   0xd   : > { %p997_p3 = por %p57_p2, %p56_p1  ;;  %p62_p4 = scmp.ne.s32.totalorder %s883_s19, %s879_s18 }
   0xe   : > { %p42_p5 = scmp.ge.s32.totalorder %s1200_s29, 2  ;;  %p63_p6 = scmp.eq.s32.totalorder %s650_s26, 0 }
   0xf   : > { %p174_p7 = scmp.eq.s32.totalorder %s650_s26, 3  ;;  %p180_p8 = scmp.eq.s32.totalorder %s651_s27, 3 }
  0x10   : > { %s1202_s29 = smov (%p42_p5, %s1200_s29), 0  ;;  %p1005_p9 = por %p63_p6, %p62_p4 }
  0x11   : > { %1185 = sst [smem:[#allocation12_spill]] %s1202_s29  ;;  %p1009_p10 = por %p174_p7, %p56_p1 }
  0x12   : > { %s44_s9 = ssub.s32 %s903_s24, %s1202_s29  ;;  %p1015_p11 = por %p180_p8, %p62_p4 }
  0x13   : > { %p47_p12 = scmp.eq.s32.totalorder %s44_s9, 0  ;;  %p685_p13 = scmp.lt.s32.totalorder %s907_s25, 4 }
  0x14   : > { %s212_s11 = sand.u32 1, %s887_s20   ;;  %s671_s14 = sshll.u32 %s903_s24, 6 }
  0x15   : > { %s1022_s12 = scalar_select %p47_p12, %s887_s20, %s49_s30  }
  0x16   : > { %s654_s13 = sshll.u32 %s212_s11, 6  ;;  %s223_s17 = scalar_lea.hbm %s1174_s0, %s671_s14 }
  0x17   : > { %s216_s26 = scalar_lea.vmem [#allocation4], %s654_s13  ;;  %s224_s28 = sshll.u32 %s223_s17, 4  ;;  %s225_s28 = int_to_ptr.hbm [resolvable:$true] %s224_s28 }
  0x18   : > { %s226_s27 = sshll.u32 %s216_s26, 4  ;;  %p678_p0 = pnand %p685_p13, %p997_p3  ;;  %s227_s27 = int_to_ptr.vmem [resolvable:$true] %s226_s27 }
  0x19   : > { %p657_p1 = scmp.ge.s32.totalorder %s907_s25, 1  ;;  %s213_s9 = scalar_lea.sflag [#allocation5], %s212_s11 }
  0x1a   : > { %s909_s29 = smov 256   ;;  %s910_s23 = smov 16  }
  0x1b   : > { %680 = dma.hbm_to_vmem [thread:$0]  (!%p678_p0), %s225_s28, 1024, %s227_s27, %s213_s9, %s909_s29, %s909_s29, %s910_s23  }
  0x1c   : > { %p234_p2 = scmp.lt.s32.totalorder %s907_s25, 5 }
  0x1e   : > { %p235_p4 = pnand %p657_p1, %p234_p2 }
  0x1f   : > { %s1033_s30 = sand.u32 (!%p235_p4), 1, %s883_s19  }
  0x20   : > { %238 = sbr.rel (%p235_p4) target bundleno = 637 (0x27d), region = 40  ;;  %s658_s13 = sshll.u32 (!%p235_p4), %s1033_s30, 6 }
  0x21   : > { %s241_s14 = scalar_lea.sflag (!%p235_p4), [#allocation5], %s1033_s30  ;;  %s1037_s15 = scalar_lea.vmem (!%p235_p4), [#allocation4], %s658_s13 }
  0x25   : > { %870 = dma.done.wait (%p1005_p9), %s241_s14, 1024  }
  0x26   : > { %872 = vsyncadd (%p1005_p9), %s241_s14, 4294966272  ;;  %s1043_s6 = scalar_lea.vmem [#allocation7], %s658_s13  ;;  %p660_p3 = scmp.ne.s32.totalorder %s891_s21, 0 }
  0x28   : > { %278 = sbr.rel (%p660_p3) target bundleno = 483 (0x1e3), region = 48 }
  0x2d   : > { %v292_v0 = vld [vmem:[%s1037_s15 + $0x20] sm:$0xff]  ;;  %v293_v1 = vld [vmem:[%s1037_s15 + $0x28] sm:$0xff]  ;;  %v294_v6 = vld [vmem:[%s1037_s15 + $0x30] sm:$0xff]  ;;  %vm283_vm0 = vcmask 7168   ;;  %v911_v12 = vmov 0.0   ;;  %v912_v13 = vmov 0  }
  0x2e   : > { %v306_v2 = vadd.f32 %v293_v1, %v292_v0  ;;  %v288_v3 = vld [vmem:[%s1037_s15] sm:$0xff]  ;;  %v289_v4 = vld [vmem:[%s1037_s15 + $0x8] sm:$0xff]  ;;  %v295_v7 = vld [vmem:[%s1037_s15 + $0x38] sm:$0xff]  ;;  %286 = vst.msk [vmem:[#allocation2 + $0x10] sm:$0xff] %vm283_vm0, %v911_v12  ;;  %759 = vset.pattern.permute.xlu0 %v912_v13  ;;  %760 = vset.pattern.permute.xlu1 %v912_v13  ;;  %vm360_vm1 = vcmask 15360  }
  0x2f   : > { %v300_v5 = vadd.f32 %v289_v4, %v288_v3  ;;  %v290_v8 = vld [vmem:[%s1037_s15 + $0x10] sm:$0xff]  ;;  %v291_v9 = vld [vmem:[%s1037_s15 + $0x18] sm:$0xff]  ;;  %v309_v10 = vadd.f32 %v295_v7, %v294_v6  ;;  %284 = vst.msk [vmem:[#allocation2] sm:$0xff] %vm283_vm0, %v911_v12  ;;  %758 = vset.pattern.permute.xlu2 %v912_v13  ;;  %v332_v35 = vld [vmem:[%s1175_s1] sm:$0xff] }
  0x30   : > { %307 = vadd.xlane.f32.xlu1 %v306_v2  ;;  %v303_v11 = vadd.f32 %v291_v9, %v290_v8  ;;  %285 = vst.msk [vmem:[#allocation2 + $0x8] sm:$0xff] %vm283_vm0, %v911_v12  ;;  %v333_v36 = vld [vmem:[%s1175_s1 + $0x8] sm:$0xff]  ;;  %v334_v38 = vld [vmem:[%s1175_s1 + $0x10] sm:$0xff]  ;;  %v335_v45 = vld [vmem:[%s1175_s1 + $0x18] sm:$0xff] }
  0x31   : > { %301 = vadd.xlane.f32.xlu0 %v300_v5  ;;  %287 = vst.msk [vmem:[#allocation2 + $0x18] sm:$0xff] %vm283_vm0, %v911_v12  ;;  %v374_v58 = vld [vmem:[%s1176_s2] sm:$0x1]  ;;  %v379_v62 = vld [vmem:[%s1177_s3 + $0x10] sm:$0xff]  ;;  %v378_v63 = vld [vmem:[%s1177_s3 + $0x8] sm:$0xff] }
  0x32   : > { %v377_v0 = vld [vmem:[%s1177_s3] sm:$0xff]  ;;  %v380_v8 = vld [vmem:[%s1177_s3 + $0x18] sm:$0xff]  ;;  %v399_v12 = vld [vmem:[%s1178_s4 + $0x8] sm:$0xff] }
  0x33   : > { %v398_v13 = vld [vmem:[%s1178_s4] sm:$0xff] }
  0x35   : > { %v298_v14 = vld [vmem:[#allocation2 + $0x10] sm:$0xff] }
  0x36   : > { %v296_v15 = vld [vmem:[#allocation2] sm:$0xff] }
  0x37   : > { %v297_v21 = vld [vmem:[#allocation2 + $0x8] sm:$0xff] }
  0x38   : > { %310 = vadd.xlane.f32.xlu1 %v309_v10  ;;  %v299_v20 = vld [vmem:[#allocation2 + $0x18] sm:$0xff] }
  0x39   : > { %304 = vadd.xlane.f32.xlu0 %v303_v11  ;;  %v400_v11 = vld [vmem:[%s1178_s4 + $0x10] sm:$0xff] }
  0xa3   : > { %v308_v16 = vpop.xlane.xlu1 %307 }
  0xa4   : > { %v314_v17 = vadd.f32 %v308_v16, %v298_v14  ;;  %v302_v18 = vpop.xlane.xlu0 %301 }
  0xa5   : > { %v312_v19 = vadd.f32 %v302_v18, %v296_v15 }
  0xa6   : > { %319 = vst.msk [vmem:[#allocation2 + $0x10] sm:$0xff] %vm283_vm0, %v314_v17 }
  0xa7   : > { %317 = vst.msk [vmem:[#allocation2] sm:$0xff] %vm283_vm0, %v312_v19 }
  0xab   : > { %v311_v22 = vpop.xlane.xlu1 %310 }
  0xac   : > { %v315_v23 = vadd.f32 %v311_v22, %v299_v20  ;;  %v305_v24 = vpop.xlane.xlu0 %304 }
  0xad   : > { %v326_v25 = vld [vmem:[#allocation2 + $0x10] sm:$0xff]  ;;  %v313_v26 = vadd.f32 %v305_v24, %v297_v21 }
  0xae   : > { %320 = vst.msk [vmem:[#allocation2 + $0x18] sm:$0xff] %vm283_vm0, %v315_v23  ;;  %v330_v27 = vmul.f32 0.00390625, %v326_v25  ;;  %v324_v28 = vld [vmem:[#allocation2] sm:$0xff]  ;;  %v401_v23 = vld [vmem:[%s1178_s4 + $0x18] sm:$0xff] }
  0xaf   : > { %318 = vst.msk [vmem:[#allocation2 + $0x8] sm:$0xff] %vm283_vm0, %v313_v26  ;;  %v328_v29 = vmul.f32 0.00390625, %v324_v28 }
  0xb0   : > { %348 = vperm.xlu0 %759, %v330_v27  }
  0xb1   : > { %338 = vperm.xlu2 %758, %v328_v29  }
  0xb5   : > { %v327_v30 = vld [vmem:[#allocation2 + $0x18] sm:$0xff] }
  0xb6   : > { %v331_v31 = vmul.f32 0.00390625, %v327_v30  ;;  %v325_v32 = vld [vmem:[#allocation2 + $0x8] sm:$0xff] }
  0xb7   : > { %v329_v33 = vmul.f32 0.00390625, %v325_v32 }
  0xb8   : > { %353 = vperm.xlu1 %760, %v331_v31  }
  0xb9   : > { %343 = vperm.xlu2 %758, %v329_v33  }
 0x10b   : > { %v339_v34 = vpop.permute.xlu2 %338 }
 0x10c   : > { %v356_v40 = vmul.f32 %v339_v34, %v332_v35 }
 0x10e   : > { %v361_v43 = vsel %vm360_vm1, %v356_v40, 0.0 }
 0x113   : > { %v344_v37 = vpop.permute.xlu2 %343 }
 0x114   : > { %v357_v41 = vmul.f32 %v344_v37, %v333_v36 }
 0x116   : > { %v362_v44 = vsel %vm360_vm1, %v357_v41, 0.0 }
 0x117   : > { %v363_v47 = vadd.f32 %v362_v44, %v361_v43 }
 0x122   : > { %v349_v39 = vpop.permute.xlu0 %348 }
 0x123   : > { %v358_v42 = vmul.f32 %v349_v39, %v334_v38 }
 0x125   : > { %v364_v46 = vsel %vm360_vm1, %v358_v42, 0.0 }
 0x126   : > { %v365_v50 = vadd.f32 %v364_v46, %v363_v47 }
 0x12a   : > { %v354_v48 = vpop.permute.xlu1 %353 }
 0x12b   : > { %v359_v49 = vmul.f32 %v354_v48, %v335_v45 }
 0x12d   : > { %v366_v51 = vsel %vm360_vm1, %v359_v49, 0.0 }
 0x12e   : > { %v367_v52 = vadd.f32 %v366_v51, %v365_v50 }
 0x130   : > { %v368_v53 = vrot.slane %v367_v52, 4 }
 0x132   : > { %v369_v54 = vadd.f32 %v368_v53, %v367_v52 }
 0x134   : > { %v370_v55 = vrot.slane %v369_v54, 2 }
 0x136   : > { %v371_v56 = vadd.f32 %v370_v55, %v369_v54 }
 0x138   : > { %v372_v57 = vrot.slane %v371_v56, 1 }
 0x13a   : > { %v373_v59 = vadd.f32 %v372_v57, %v371_v56 }
 0x13c   : > { %v375_v60 = vadd.f32 %v374_v58, %v373_v59 }
 0x13e   : > { %v376_v61 = vmax.f32 %v375_v60, 0.0 }
 0x140   : > { %v381_v1 = vperm.slane %v376_v61, 0 }
 0x142   : > { %v384_v2 = vmul.f32 %v381_v1, %v379_v62  ;;  %v383_v3 = vmul.f32 %v381_v1, %v378_v63  ;;  %v382_v4 = vmul.f32 %v381_v1, %v377_v0  ;;  %v385_v9 = vmul.f32 %v381_v1, %v380_v8 }
 0x144   : > { %v392_v5 = vsel %vm360_vm1, %v384_v2, 0.0  ;;  %v389_v6 = vsel %vm360_vm1, %v383_v3, 0.0  ;;  %v386_v7 = vsel %vm360_vm1, %v382_v4, 0.0  ;;  %v395_v10 = vsel %vm360_vm1, %v385_v9, 0.0 }
 0x145   : > { %393 = vadd.xlane.f32.xlu0 %v392_v5  ;;  %390 = vadd.xlane.f32.xlu1 %v389_v6 }
 0x146   : > { %387 = vadd.xlane.f32.xlu2 %v386_v7 }
 0x14e   : > { %396 = vadd.xlane.f32.xlu2 %v395_v10 }
 0x1b8   : > { %v394_v14 = vpop.xlane.xlu0 %393  ;;  %v391_v15 = vpop.xlane.xlu1 %390 }
 0x1b9   : > { %v404_v16 = vadd.f32 %v400_v11, %v394_v14  ;;  %v403_v17 = vadd.f32 %v399_v12, %v391_v15  ;;  %v388_v18 = vpop.xlane.xlu2 %387 }
 0x1ba   : > { %v402_v19 = vadd.f32 %v398_v13, %v388_v18 }
 0x1bb   : > { %v663_v20 = vmul.f32 -1.442695, %v404_v16  ;;  %v662_v21 = vmul.f32 -1.442695, %v403_v17 }
 0x1bc   : > { %v661_v22 = vmul.f32 -1.442695, %v402_v19 }
 0x1bd   : > { %761 = vpow2.f32 %v663_v20 }
 0x1be   : > { %763 = vpow2.f32 %v662_v21 }
 0x1bf   : > { %765 = vpow2.f32 %v661_v22 }
 0x1c1   : > { %v397_v24 = vpop.xlane.xlu2 %396 }
 0x1c2   : > { %v405_v25 = vadd.f32 %v401_v23, %v397_v24 }
 0x1c3   : > { %v762_v26 = vpop.eup %761 }
 0x1c4   : > { %v764_v27 = vpop.eup %763  ;;  %v420_v28 = vadd.f32 1.0, %v762_v26  ;;  %v664_v29 = vmul.f32 -1.442695, %v405_v25 }
 0x1c5   : > { %v766_v30 = vpop.eup %765  ;;  %v419_v31 = vadd.f32 1.0, %v764_v27 }
 0x1c6   : > { %767 = vrcp.f32 %v420_v28  ;;  %v418_v32 = vadd.f32 1.0, %v766_v30  ;;  %v461_v39 = vand.u32 2147483647, %v420_v28  ;;  %v463_v42 = vand.u32 2147483648, %v420_v28 }
 0x1c7   : > { %769 = vrcp.f32 %v419_v31  ;;  %v448_v44 = vand.u32 2147483648, %v419_v31  ;;  %vm457_vm3 = vweird.f32 %v420_v28  ;;  %v446_v48 = vand.u32 2147483647, %v419_v31 }
 0x1c8   : > { %771 = vpow2.f32 %v664_v29  ;;  %vm462_vm5 = vcmp.eq.f32.partialorder %v461_v39, 8.507059e+37  ;;  %vm442_vm6 = vweird.f32 %v419_v31  ;;  %v464_v51 = vor.u32 1.1754944e-38, %v463_v42 }
 0x1c9   : > { %773 = vrcp.f32 %v418_v32  ;;  %v449_v53 = vor.u32 1.1754944e-38, %v448_v44  ;;  %v433_v54 = vand.u32 2147483648, %v418_v32  ;;  %v431_v57 = vand.u32 2147483647, %v418_v32 }
 0x1ca   : > { %vm447_vm10 = vcmp.eq.f32.partialorder %v446_v48, 8.507059e+37  ;;  %vm427_vm11 = vweird.f32 %v418_v32 }
 0x1cb   : > { %v434_v63 = vor.u32 1.1754944e-38, %v433_v54  ;;  %vm432_vm13 = vcmp.eq.f32.partialorder %v431_v57, 8.507059e+37 }
 0x1cc   : > { %v768_v33 = vpop.eup %767 }
 0x1cd   : > { %v770_v34 = vpop.eup %769  ;;  %v453_v35 = vmul.f32 %v768_v33, %v420_v28  ;;  %vm458_vm2 = vweird.f32 %v768_v33 }
 0x1ce   : > { %v772_v36 = vpop.eup %771  ;;  %v438_v37 = vmul.f32 %v770_v34, %v419_v31  ;;  %vm443_vm4 = vweird.f32 %v770_v34  ;;  %vm459_vm7 = vmor %vm457_vm3, %vm458_vm2 }
 0x1cf   : > { %v454_v38 = vsub.f32 1.0, %v453_v35  ;;  %v421_v40 = vadd.f32 1.0, %v772_v36  ;;  %v774_v41 = vpop.eup %773  ;;  %vm444_vm8 = vmor %vm442_vm6, %vm443_vm4 }
 0x1d0   : > { %v439_v43 = vsub.f32 1.0, %v438_v37  ;;  %v423_v46 = vmul.f32 %v774_v41, %v418_v32  ;;  %vm428_vm9 = vweird.f32 %v774_v41 }
 0x1d1   : > { %v455_v45 = vmul.f32 %v768_v33, %v454_v38  ;;  %775 = vrcp.f32 %v421_v40  ;;  %vm429_vm12 = vmor %vm427_vm11, %vm428_vm9  ;;  %v478_v4 = vand.u32 2147483648, %v421_v40  ;;  %v476_v6 = vand.u32 2147483647, %v421_v40 }
 0x1d2   : > { %v440_v47 = vmul.f32 %v770_v34, %v439_v43  ;;  %v424_v50 = vsub.f32 1.0, %v423_v46  ;;  %vm472_vm15 = vweird.f32 %v421_v40 }
 0x1d3   : > { %v456_v49 = vadd.f32 %v768_v33, %v455_v45  ;;  %v479_v8 = vor.u32 1.1754944e-38, %v478_v4  ;;  %vm477_vm2 = vcmp.eq.f32.partialorder %v476_v6, 8.507059e+37 }
 0x1d4   : > { %v441_v52 = vadd.f32 %v770_v34, %v440_v47  ;;  %v425_v56 = vmul.f32 %v774_v41, %v424_v50 }
 0x1d5   : > { %v460_v55 = vsel %vm459_vm7, %v768_v33, %v456_v49 }
 0x1d6   : > { %v465_v58 = vsel %vm462_vm5, %v464_v51, %v460_v55  ;;  %v445_v59 = vsel %vm444_vm8, %v770_v34, %v441_v52  ;;  %v426_v62 = vadd.f32 %v774_v41, %v425_v56 }
 0x1d7   : > { %v776_v60 = vpop.eup %775  ;;  %484 = vst.msk [vmem:[#allocation3 + $0x10] sm:$0xff] %vm283_vm0, %v465_v58  ;;  %v450_v61 = vsel %vm447_vm10, %v449_v53, %v445_v59 }
 0x1d8   : > { %483 = vst.msk [vmem:[#allocation3 + $0x8] sm:$0xff] %vm283_vm0, %v450_v61  ;;  %v468_v0 = vmul.f32 %v776_v60, %v421_v40  ;;  %v430_v1 = vsel %vm429_vm12, %v774_v41, %v426_v62  ;;  %vm473_vm14 = vweird.f32 %v776_v60 }
 0x1d9   : > { %v435_v2 = vsel %vm432_vm13, %v434_v63, %v430_v1  ;;  %vm474_vm1 = vmor %vm472_vm15, %vm473_vm14 }
 0x1da   : > { %v469_v3 = vsub.f32 1.0, %v468_v0  ;;  %482 = vst.msk [vmem:[#allocation3] sm:$0xff] %vm283_vm0, %v435_v2 }
 0x1dc   : > { %v470_v5 = vmul.f32 %v776_v60, %v469_v3 }
 0x1de   : > { %v471_v7 = vadd.f32 %v776_v60, %v470_v5 }
 0x1e0   : > { %v475_v9 = vsel %vm474_vm1, %v776_v60, %v471_v7 }
 0x1e1   : > { %v480_v10 = vsel %vm477_vm2, %v479_v8, %v475_v9 }
 0x1e2   : > { %485 = vst.msk [vmem:[#allocation3 + $0x18] sm:$0xff] %vm283_vm0, %v480_v10 }
 0x1e3 PF: > { %p665_p5 = scmp.ne.s32.totalorder %s891_s21, 1 }
 0x1e5   : > { %489 = sbr.rel (%p665_p5) target bundleno = 621 (0x26d), region = 60 }
 0x1ea   : > { %v492_v11 = vld [vmem:[#allocation3 + $0x10] sm:$0xff]  ;;  %v490_v12 = vld [vmem:[#allocation3] sm:$0xff]  ;;  %v913_v13 = vmov 0   ;;  %v493_v14 = vld [vmem:[#allocation3 + $0x18] sm:$0xff] }
 0x1eb   : > { %778 = vset.pattern.permute.xlu1 %v913_v13  ;;  %777 = vset.pattern.permute.xlu0 %v913_v13  ;;  %v491_v15 = vld [vmem:[#allocation3 + $0x8] sm:$0xff]  ;;  %v498_v16 = vld [vmem:[%s1037_s15 + $0x20] sm:$0xff]  ;;  %v500_v26 = vld [vmem:[%s1037_s15 + $0x30] sm:$0xff] }
 0x1ec   : > { %514 = vperm.xlu1 %778, %v492_v11   ;;  %504 = vperm.xlu0 %777, %v490_v12   ;;  %v499_v17 = vld [vmem:[%s1037_s15 + $0x28] sm:$0xff]  ;;  %v494_v18 = vld [vmem:[%s1037_s15] sm:$0xff]  ;;  %v501_v27 = vld [vmem:[%s1037_s15 + $0x38] sm:$0xff] }
 0x1ed   : > { %v495_v19 = vld [vmem:[%s1037_s15 + $0x8] sm:$0xff]  ;;  %v496_v28 = vld [vmem:[%s1037_s15 + $0x10] sm:$0xff]  ;;  %v497_v29 = vld [vmem:[%s1037_s15 + $0x18] sm:$0xff] }
 0x1f4   : > { %519 = vperm.xlu1 %778, %v493_v14   ;;  %509 = vperm.xlu0 %777, %v491_v15  }
 0x25e   : > { %v515_v20 = vpop.permute.xlu1 %514  ;;  %v505_v21 = vpop.permute.xlu0 %504 }
 0x25f   : > { %v526_v22 = vmul.f32 %v515_v20, %v498_v16  ;;  %v527_v23 = vmul.f32 %v515_v20, %v499_v17  ;;  %v522_v24 = vmul.f32 %v505_v21, %v494_v18  ;;  %v523_v25 = vmul.f32 %v505_v21, %v495_v19 }
 0x261   : > { %534 = vst [vmem:[%s1043_s6 + $0x20] sm:$0xff] %v526_v22 }
 0x262   : > { %535 = vst [vmem:[%s1043_s6 + $0x28] sm:$0xff] %v527_v23 }
 0x263   : > { %530 = vst [vmem:[%s1043_s6] sm:$0xff] %v522_v24 }
 0x264   : > { %531 = vst [vmem:[%s1043_s6 + $0x8] sm:$0xff] %v523_v25 }
 0x266   : > { %v520_v30 = vpop.permute.xlu1 %519  ;;  %v510_v31 = vpop.permute.xlu0 %509 }
 0x267   : > { %v528_v32 = vmul.f32 %v520_v30, %v500_v26  ;;  %v529_v33 = vmul.f32 %v520_v30, %v501_v27  ;;  %v524_v34 = vmul.f32 %v510_v31, %v496_v28  ;;  %v525_v35 = vmul.f32 %v510_v31, %v497_v29 }
 0x269   : > { %536 = vst [vmem:[%s1043_s6 + $0x30] sm:$0xff] %v528_v32 }
 0x26a   : > { %537 = vst [vmem:[%s1043_s6 + $0x38] sm:$0xff] %v529_v33 }
 0x26b   : > { %532 = vst [vmem:[%s1043_s6 + $0x10] sm:$0xff] %v524_v34 }
 0x26c   : > { %533 = vst [vmem:[%s1043_s6 + $0x18] sm:$0xff] %v525_v35 }
 0x26d PF: > { %s672_s21 = sshll.u32 %s895_s22, 6  ;;  %s554_s11 = sshll.u32 %s1043_s6, 4  ;;  %s555_s11 = int_to_ptr.vmem [resolvable:$true] %s554_s11 }
 0x26e   : > { %s553_s15 = scalar_lea.hbm %s1179_s5, %s672_s21  ;;  %s539_s17 = scalar_lea.sflag [#allocation6], %s1033_s30 }
 0x26f   : > { %s556_s16 = sshll.u32 %s553_s15, 4  ;;  %s829_s22 = scalar_lea.hbm %s1179_s5, 128  ;;  %s557_s16 = int_to_ptr.hbm [resolvable:$true] %s556_s16 }
 0x270   : > { %s823_s26 = sshra.s32 %s557_s16, 4  ;;  %s824_s26 = int_to_ptr.hbm [resolvable:$true] %s823_s26 }
 0x271   : > { %s825_s27 = scalar_lea.hbm %s824_s26, 64  ;;  %p830_p9 = scmp.lt.s32.totalorder %s824_s26, %s1179_s5 }
 0x272   : > { %p826_p6 = scmp.ne.s32.totalorder %s824_s26, %s825_s27  ;;  %p831_p12 = scmp.lt.s32.totalorder %s829_s22, %s825_s27 }
 0x274   : > { %p827_p7 = pnand %p826_p6, %p1009_p10  ;;  %p832_p13 = por %p831_p12, %p830_p9 }
 0x276   : > { %p828_p8 = pneg %p827_p7 }
 0x278   : > { %p833_p0 = pnand %p832_p13, %p828_p8 }
 0x27a   : > { %836 = shalt.err (!%p833_p0)
}
 0x27b   : > { %s914_s30 = smov 256   ;;  %s915_s6 = smov 16  }
 0x27c   : > { %675 = dma.vmem_to_hbm [thread:$0]  (%p1009_p10), %s555_s11, 1024, %s557_s16, %s539_s17, %s914_s30, %s914_s30, %s915_s6  }
 0x27d PF: > { %p686_p1 = scmp.ge.s32.totalorder %s907_s25, 2  ;;  %s571_s28 = sand.u32 1, %s879_s18  }
 0x27e   : > { %s572_s21 = scalar_lea.sflag [#allocation6], %s571_s28 }
 0x27f   : > { %p682_p2 = pnand %p686_p1, %p1015_p11 }
 0x281   : > { %p683_p4 = pneg %p682_p2 }
 0x283   : > { %874 = dma.done.wait (%p683_p4), %s572_s21, 1024  }
 0x284   : > { %876 = vsyncadd (%p683_p4), %s572_s21, 4294966272  ;;  %s21_s25 = sadd.s32 1, %s907_s25   ;;  %s1189_s21 = sld [smem:[#allocation10_spill]] }
 0x285   : > { %p18_p3 = scmp.ge.s32.totalorder %s21_s25, 6   ;;  %s1190_s23 = sld [smem:[#allocation11_spill]] }
 0x286   : > { %s1191_s8 = sld [smem:[#allocation12_spill]]  ;;  %s1192_s18 = smov %s883_s19 }
 0x287   : > { %s1193_s19 = smov %s887_s20  ;;  %s1194_s20 = smov %s1022_s12 }
 0x288   : > { %s1195_s22 = smov %s903_s24  ;;  %20 = sbr.rel (!%p18_p3) target bundleno = 7 (0x7), region = 101 }
 0x28c   : > { %s1196_s24 = smov %s1191_s8 }
 0x28d   :  { %578 = vsyncpa [#allocation5], 1 }
 0x28e   :  { %580 = vsyncpa [#allocation5 + $0x1], 1 }
 0x28f   :  { %581 = vsyncpa [#allocation6], 1 }
 0x290   :  { %583 = vsyncpa [#allocation6 + $0x1], 1 }

</bundles_post_ra>
